<compile_context>
chip_gen: v6e
topology: v6e:2x2x1
jax: 0.10.0
libtpu: 0.0.40
codegen_flags: <defaults>
</compile_context>

<pallas_src>
import numpy as np
import jax
import jax.numpy as jnp
from jax.experimental import pallas as pl
from jax.experimental.pallas import tpu as pltpu


def _round_up(x, m):
    return ((x + m - 1) // m) * m


def _choose_tile_n(n, tile_n_max):
    """Largest tile <= tile_n_max (multiple of 128) that still yields >=2 grid steps
    whenever n allows it (keeps both v7x TensorCores busy via dimension_semantics)."""
    half_n = -(-n // 2)                              # ceil(n / 2)
    tile = min(_round_up(max(tile_n_max, 128), 128),
               _round_up(max(half_n, 1), 128))
    return max(tile, 128)


def sin_embedder_kernel(t_ref, inv_freq_ref, w_ref, o_ref):
    t_row = t_ref[...]               # (1, TILE_N) f32, timesteps on lanes
    inv_freq = inv_freq_ref[...]     # (half, 1)   f32
    freqs = inv_freq * t_row         # (half, TILE_N), lane-dense
    # NOTE: (t - t.detach())[..., None] + freqs.detach() only changes gradients;
    # the forward value equals freqs.
    # TODO(synk): custom_vjp reproducing the straight-through d(freqs)/dt gradient is needed
    # for training parity; this kernel is forward-only.
    emb_t = jnp.concatenate([jnp.sin(freqs), jnp.cos(freqs)], axis=0)        # (dim, TILE_N)
    out_t = jnp.dot(w_ref[...], emb_t, preferred_element_type=jnp.float32)   # (dim, TILE_N)
    # In-kernel transpose (XLU slot) -> direct (TILE_N, dim) store; avoids a separate
    # full read+write HBM transpose pass in the wrapper.
    o_ref[...] = out_t.T.astype(o_ref.dtype)


def prepare_sin_embedder_params(inv_freq, w):
    """One-time parameter prep, hoisted out of the per-call path.

    inv_freq: (dim//2,); w: (dim, dim) torch-style Linear weight (out_features, in_features).
    In the transposed formulation W is used directly -- no per-call transpose/slices."""
    dim = w.shape[0]
    assert w.shape == (dim, dim), w.shape
    assert dim % 2 == 0, "SinEmbedder requires an even dim"
    half = dim // 2
    return {
        "inv_freq_col": jnp.asarray(inv_freq, jnp.float32).reshape(half, 1),
        "w": jnp.asarray(w, jnp.float32),
        "dim": dim,
    }


def sin_embedder(t, params, *, tile_n_max=4096, out_dtype=jnp.float32):
    """t: arbitrary-shape float array of timesteps; params: prepare_sin_embedder_params().

    out_dtype=jnp.bfloat16 is recommended on mem-bound v5e/v6e when the consumer tolerates it
    (compute and accumulation stay f32; only the final store is cast)."""
    dim = params["dim"]
    half = dim // 2
    inv_freq_col = params["inv_freq_col"]
    w = params["w"]

    orig_shape = t.shape
    n = int(np.prod(orig_shape)) if orig_shape else 1

    # Lane-dense layout: timesteps on the lane axis.  No materialized padding -- Pallas
    # handles the ragged boundary block; padded rows are never written back.
    t_row = t.astype(jnp.float32).reshape(1, n)

    tile_n = _choose_tile_n(n, tile_n_max)
    grid = (pl.cdiv(n, tile_n),)

    cost = pl.CostEstimate(
        flops=2 * dim * dim * n,                       # W @ emb.T
        transcendentals=dim * n,                       # sin + cos over (half, n)
        bytes_accessed=4 * (n + half + dim * dim + dim * n),
    )

    out = pl.pallas_call(
        sin_embedder_kernel,
        out_shape=jax.ShapeDtypeStruct((n, dim), out_dtype),
        grid=grid,
        in_specs=[
            pl.BlockSpec((1, tile_n), lambda i: (0, i)),   # t row tile (pipelined)
            pl.BlockSpec((half, 1), lambda i: (0, 0)),     # inv_freq (resident)
            pl.BlockSpec((dim, dim), lambda i: (0, 0)),    # W (resident)
        ],
        out_specs=pl.BlockSpec((tile_n, dim), lambda i: (i, 0)),
        compiler_params=pltpu.CompilerParams(
            dimension_semantics=("parallel",)),            # megacore sharding on v7x
        cost_estimate=cost,
    )(t_row, inv_freq_col, w)

    return out.reshape(*orig_shape, dim)                   # metadata-only reshape


def sin_embedder_ref(t, inv_freq, w):
    """Pure-JAX reference mirroring the PyTorch forward."""
    freqs = t.astype(jnp.float32)[..., None] * inv_freq.astype(jnp.float32)
    emb = jnp.concatenate([jnp.sin(freqs), jnp.cos(freqs)], axis=-1)
    return emb @ w.astype(jnp.float32).T


if __name__ == "__main__":
    dim, base = 32, 10000

    # Deterministic parameter init (synthetic, no checkpoint).
    inv_freq = (
        1.0 / (base ** (jnp.arange(0, dim, 2, dtype=jnp.float32) / dim))
    ).astype(jnp.float32)
    key = jax.random.PRNGKey(0)
    k_w, k_t1, k_t2 = jax.random.split(key, 3)
    bound = 1.0 / np.sqrt(dim)  # torch Linear default uniform bound
    w = jax.random.uniform(k_w, (dim, dim), jnp.float32, minval=-bound, maxval=bound)

    params = prepare_sin_embedder_params(inv_freq, w)   # hoisted one-time prep

    # Small test: (B, S) timesteps, n=16 -> single (ragged) tile, boundary padding path.
    t_small = jax.random.uniform(k_t1, (2, 8), jnp.float32, minval=0.0, maxval=1000.0)
    out_small = jax.block_until_ready(sin_embedder(t_small, params))
    assert out_small.shape == (2, 8, dim), out_small.shape
    np.testing.assert_allclose(
        np.asarray(out_small), np.asarray(sin_embedder_ref(t_small, inv_freq, w)),
        rtol=1e-5, atol=2e-5)

    # Multi-tile test: n=1200 -> tile_n=640, grid=2 (two TC split on v7x), ragged last block.
    t_big = jax.random.uniform(k_t2, (4, 300), jnp.float32, minval=0.0, maxval=1000.0)
    out_big = jax.block_until_ready(sin_embedder(t_big, params))
    assert out_big.shape == (4, 300, dim), out_big.shape
    np.testing.assert_allclose(
        np.asarray(out_big), np.asarray(sin_embedder_ref(t_big, inv_freq, w)),
        rtol=1e-5, atol=2e-5)

    print("KERNEL_OK")
</pallas_src>

<mosaic_0001>
module attributes {stable_mosaic.version = 11 : i64} {
  func.func @sin_embedder_kernel(%arg0: i32, %arg1: memref<1x128xf32, #tpu.memory_space<vmem>>, %arg2: memref<16x1xf32, #tpu.memory_space<vmem>>, %arg3: memref<32x32xf32, #tpu.memory_space<vmem>>, %arg4: memref<128x32xf32, #tpu.memory_space<vmem>>) attributes {dimension_semantics = [#tpu.dimension_semantics<parallel>], iteration_bounds = array<i64: 1>, scalar_prefetch = 0 : i64, scratch_operands = 0 : i64, tpu.core_type = #tpu.core_type<tc>, window_params = [{transform_indices = @transform_0, window_bounds = array<i64: 1, 128>}, {pipeline_mode = #tpu.pipeline_mode<synchronous>, transform_indices = @transform_1, window_bounds = array<i64: 16, 1>}, {pipeline_mode = #tpu.pipeline_mode<synchronous>, transform_indices = @transform_2, window_bounds = array<i64: 32, 32>}, {transform_indices = @transform_3, window_bounds = array<i64: 128, 32>}]} {
    %c0 = arith.constant 0 : index
    %c0_0 = arith.constant 0 : index
    %0 = vector.load %arg1[%c0, %c0_0] : memref<1x128xf32, #tpu.memory_space<vmem>>, vector<1x128xf32>
    %c0_1 = arith.constant 0 : index
    %c0_2 = arith.constant 0 : index
    %1 = vector.load %arg2[%c0_1, %c0_2] : memref<16x1xf32, #tpu.memory_space<vmem>>, vector<16x1xf32>
    %2 = vector.broadcast %1 : vector<16x1xf32> to vector<16x128xf32>
    %3 = vector.broadcast %0 : vector<1x128xf32> to vector<16x128xf32>
    %4 = arith.mulf %2, %3 : vector<16x128xf32>
    %5 = math.sin %4 : vector<16x128xf32>
    %6 = math.cos %4 : vector<16x128xf32>
    %7 = tpu.concatenate %5, %6 in 0 : vector<16x128xf32>, vector<16x128xf32> -> vector<32x128xf32>
    %c0_3 = arith.constant 0 : index
    %c0_4 = arith.constant 0 : index
    %8 = vector.load %arg3[%c0_3, %c0_4] : memref<32x32xf32, #tpu.memory_space<vmem>>, vector<32x32xf32>
    %cst = arith.constant dense<0.000000e+00> : vector<32x128xf32>
    %9 = tpu.matmul %8, %7, %cst {dimension_numbers = #tpu.dot_dimension_numbers<[1], [0], [0], [1], [0, 0, 1, 1], [], []>} : vector<32x32xf32>, vector<32x128xf32>, vector<32x128xf32> -> vector<32x128xf32>
    %10 = tpu.transpose %9, [1, 0] : vector<32x128xf32> -> vector<128x32xf32>
    %c0_5 = arith.constant 0 : index
    %c0_6 = arith.constant 0 : index
    %11 = vector.load %arg4[%c0_5, %c0_6] : memref<128x32xf32, #tpu.memory_space<vmem>>, vector<128x32xf32>
    tpu.vector_store %arg4[%c0_5, %c0_6], %10 {strides = array<i32>} : memref<128x32xf32, #tpu.memory_space<vmem>>, vector<128x32xf32>,
    return
  }
  func.func @transform_0(%arg0: i32) -> (i32, i32) {
    %c0_i32 = arith.constant 0 : i32
    %c0_i32_0 = arith.constant 0 : i32
    return %c0_i32, %arg0 : i32, i32
  }
  func.func @transform_1(%arg0: i32) -> (i32, i32) {
    %c0_i32 = arith.constant 0 : i32
    %c0_i32_0 = arith.constant 0 : i32
    %c0_i32_1 = arith.constant 0 : i32
    return %c0_i32, %c0_i32_0 : i32, i32
  }
  func.func @transform_2(%arg0: i32) -> (i32, i32) {
    %c0_i32 = arith.constant 0 : i32
    %c0_i32_0 = arith.constant 0 : i32
    %c0_i32_1 = arith.constant 0 : i32
    return %c0_i32, %c0_i32_0 : i32, i32
  }
  func.func @transform_3(%arg0: i32) -> (i32, i32) {
    %c0_i32 = arith.constant 0 : i32
    %c0_i32_0 = arith.constant 0 : i32
    return %arg0, %c0_i32 : i32, i32
  }
}

</mosaic_0001>

<bundles_post_ra>
// kernel: tpu_custom_call.1
= control target key start
LH: loop header
LB: loop body
LE: loop exit
PB: predicated region body
PF: predicated region fallthrough
CT: control target
= control target key end

     0   :  { %8 = vsyncpa [#allocation3], 0  ;;  %s901_s0 = inlined_call_operand.vmem [shape: f32[1,16], index: 0, kind: input, shape index: {}]   ;;  %s902_s1 = inlined_call_operand.vmem [shape: f32[16,1], index: 1, kind: input, shape index: {}]   ;;  %s903_s2 = inlined_call_operand.hbm [shape: f32[32,32], index: 2, kind: input, shape index: {}]   ;;  %s904_s3 = inlined_call_operand.hbm [shape: f32[16,32], index: 3, kind: output, shape index: {}]  }
   0x1   :  { %9 = vsyncpa [#allocation4], 0  ;;  %s755_s12 = smov [#allocation2]  }
   0x2   :  { %s19_s13 = sshll.u32 %s755_s12, 4  ;;  %s20_s13 = int_to_ptr.vmem [resolvable:$true] %s19_s13 }
   0x3   :  { %s719_s14 = scalar_lea.vmem %s20_s13, 512  ;;  %p724_p1 = scmp.lt.s32.totalorder %s20_s13, %s20_s13 }
   0x4   :  { %p720_p0 = scmp.ne.s32.totalorder %s20_s13, %s719_s14  ;;  %p725_p2 = scmp.lt.s32.totalorder %s719_s14, %s719_s14 }
   0x6   :  { %p726_p3 = por %p725_p2, %p724_p1 }
   0x8   :  { %p727_p4 = pnand %p726_p3, %p720_p0 }
   0xa   :  { %730 = shalt.err (!%p727_p4)
}
   0xb   :  { %s756_s15 = smov 128   ;;  %s757_s16 = smov 8  }
   0xc   :  { %25 = dma.hbm_to_vmem [thread:$0]  %s903_s2, 512, %s20_s13, [#allocation3], %s756_s15, %s756_s15, %s757_s16  }
   0xd   :  { %751 = dma.done.wait [#allocation3], 512  }
   0xe   :  { %752 = vsyncadd [#allocation3], 4294966784  ;;  %v758_v0 = vmov 0   ;;  %v31_v1 = vld [vmem:[%s902_s1 + $0x8] sm:$0xff]  ;;  %v30_v2 = vld [vmem:[%s902_s1] sm:$0xff]  ;;  %vm468_vm0 = vcmask 261120  }
   0xf   :  { %702 = vset.pattern.permute.xlu0 %v758_v0  ;;  %v464_v3 = vld [vmem:[#allocation2] sm:$0xff]  ;;  %v466_v4 = vld [vmem:[#allocation2 + $0x10] sm:$0xff]  ;;  %v759_v26 = vmov 683565275   ;;  %v760_v30 = vmov 2475754826  }
  0x10   :  { %39 = vperm.xlu0 %702, %v31_v1   ;;  %668 = vmatprep.mubr.msk.f32.mxu0 %vm468_vm0, %v464_v3  ;;  %v631_v5 = vld [vmem:[%s901_s0] ss:$0 sm:$0xff]  ;;  %v761_v32 = vmov 2131351028   ;;  %v762_v34 = vmov 2102212464  }
  0x11   :  { %671 = vmatprep.mubr.msk.f32.mxu1 %vm468_vm0, %v466_v4  ;;  %v763_v36 = vmov 920167782   ;;  %v764_v43 = vmov 1326507024  }
  0x14   :  { %34 = vperm.xlu0 %702, %v30_v2  }
  0x8b   :  { %v40_v6 = vpop.permute.xlu0 %39 }
  0x8c   :  { %v803_v7 = vmul.f32 %v631_v5, %v40_v6 }
  0x8e   :  { %v154_v8 = vand.u32 2147483647, %v803_v7  ;;  %v157_v9 = vand.u32 2139095040, %v803_v7  ;;  %vm156_vm15 = vcmp.lt.s32.totalorder %v803_v7, 0 }
  0x8f   :  { %v35_v10 = vpop.permute.xlu0 %34 }
  0x90   :  { %v158_v11 = vshrl.u32 %v157_v9, 23  ;;  %v807_v12 = vmul.f32 %v631_v5, %v35_v10  ;;  %v161_v13 = vand.u32 8388607, %v154_v8 }
  0x92   :  { %v636_v14 = vadd.s32 4294967169, %v158_v11  ;;  %v53_v15 = vand.u32 2139095040, %v807_v12  ;;  %v162_v17 = vor.u32 8388608, %v161_v13  ;;  %v50_v19 = vand.u32 2147483647, %v807_v12 }
  0x94   :  { %v164_v16 = vadd.s32 1, %v636_v14  ;;  %v54_v18 = vshrl.u32 %v53_v15, 23  ;;  %v813_v24 = vshll.u32 %v162_v17, 8  ;;  %v57_v28 = vand.u32 8388607, %v50_v19 }
  0x96   :  { %vm165_vm1 = vcmp.gt.s32.totalorder %v164_v16, 0  ;;  %v632_v21 = vadd.s32 4294967169, %v54_v18  ;;  %v58_v58 = vor.u32 8388608, %v57_v28 }
  0x97   :  { %v166_v20 = vsel %vm165_vm1, %v164_v16, 0  ;;  %vm155_vm1 = vcmp.le.f32.partialorder %v154_v8, 0.7853982 }
  0x98   :  { %v167_v22 = vshrl.u32 %v166_v20, 5  ;;  %v168_v23 = vand.u32 31, %v166_v20  ;;  %v60_v29 = vadd.s32 1, %v632_v21  ;;  %v98_v9 = vshll.u32 %v58_v58, 8 }
  0x9a   :  { %v169_v25 = vsub.s32 32, %v168_v23  ;;  %v171_v27 = vshll.u32 %v759_v26, %v168_v23  ;;  %v174_v31 = vshll.u32 %v760_v30, %v168_v23  ;;  %v177_v33 = vshll.u32 %v761_v32, %v168_v23 }
  0x9b   :  { %v180_v35 = vshll.u32 %v762_v34, %v168_v23  ;;  %v183_v37 = vshll.u32 %v763_v36, %v168_v23  ;;  %vm186_vm2 = vcmp.lt.s32.totalorder %v167_v22, 1  ;;  %vm188_vm3 = vcmp.lt.s32.totalorder %v167_v22, 3 }
  0x9c   :  { %v172_v38 = vshrl.u32 %v760_v30, %v169_v25  ;;  %v175_v39 = vshrl.u32 %v761_v32, %v169_v25  ;;  %v178_v40 = vshrl.u32 %v762_v34, %v169_v25  ;;  %v170_v41 = vshrl.u32 %v759_v26, %v169_v25 }
  0x9d   :  { %v181_v42 = vshrl.u32 %v763_v36, %v169_v25  ;;  %v184_v44 = vshrl.u32 %v764_v43, %v169_v25  ;;  %vm61_vm4 = vcmp.gt.s32.totalorder %v60_v29, 0  ;;  %vm189_vm5 = vcmp.lt.s32.totalorder %v167_v22, 4 }
  0x9e   :  { %v173_v45 = vor.u32 %v172_v38, %v171_v27  ;;  %v176_v46 = vor.u32 %v175_v39, %v174_v31  ;;  %v179_v47 = vor.u32 %v178_v40, %v177_v33  ;;  %v62_v50 = vsel %vm61_vm4, %v60_v29, 0 }
  0x9f   :  { %v182_v48 = vor.u32 %v181_v42, %v180_v35  ;;  %v185_v49 = vor.u32 %v184_v44, %v183_v37  ;;  %vm187_vm6 = vcmp.lt.s32.totalorder %v167_v22, 2  ;;  %v64_v61 = vand.u32 31, %v62_v50 }
  0xa0   :  { %v190_v51 = vsel %vm186_vm2, %v170_v41, %v173_v45  ;;  %v191_v52 = vsel %vm189_vm5, %v179_v47, 2102212464  ;;  %v194_v53 = vsel %vm186_vm2, %v173_v45, %v176_v46  ;;  %v198_v54 = vsel %vm186_vm2, %v176_v46, %v179_v47 }
  0xa1   :  { %v192_v55 = vsel %vm188_vm3, %v176_v46, %v191_v52  ;;  %v195_v56 = vsel %vm189_vm5, %v182_v48, 920167782  ;;  %v199_v57 = vsel %vm189_vm5, %v185_v49, 1326507024  ;;  %v63_v5 = vshrl.u32 %v62_v50, 5 }
  0xa2   :  { %v196_v59 = vsel %vm188_vm3, %v179_v47, %v195_v56  ;;  %v200_v60 = vsel %vm188_vm3, %v182_v48, %v199_v57  ;;  %v193_v62 = vsel %vm187_vm6, %v190_v51, %v192_v55  ;;  %v65_v6 = vsub.s32 32, %v64_v61 }
  0xa3   :  { %v197_v63 = vsel %vm187_vm6, %v194_v53, %v196_v59  ;;  %v201_v0 = vsel %vm187_vm6, %v198_v54, %v200_v60  ;;  %v209_v10 = vmul.u32 %v813_v24, %v193_v62  ;;  %v67_v11 = vshll.u32 %v759_v26, %v64_v61 }
  0xa4   :  { %v826_v1 = vmul.u32.u64.low %v813_v24, %v201_v0  ;;  %v827_v2 = vmul.u32.u64.high %v813_v24, %v201_v0, %v826_v1  ;;  %v830_v3 = vmul.u32.u64.low %v813_v24, %v197_v63  ;;  %v831_v4 = vmul.u32.u64.high %v813_v24, %v197_v63, %v830_v3 }
  0xa5   :  { %v70_v13 = vshll.u32 %v760_v30, %v64_v61  ;;  %v73_v14 = vshll.u32 %v761_v32, %v64_v61  ;;  %v68_v15 = vshrl.u32 %v760_v30, %v65_v6  ;;  %v71_v16 = vshrl.u32 %v761_v32, %v65_v6 }
  0xa6   :  { %v74_v17 = vshrl.u32 %v762_v34, %v65_v6  ;;  %v76_v18 = vshll.u32 %v762_v34, %v64_v61  ;;  %vm211_vm7 = vc.u32 %v827_v2, %v830_v3  ;;  %v212_v20 = vadd.s32 1, %v831_v4 }
  0xa7   :  { %v77_v21 = vshrl.u32 %v763_v36, %v65_v6  ;;  %v79_v22 = vshll.u32 %v763_v36, %v64_v61  ;;  %v69_v23 = vor.u32 %v68_v15, %v67_v11  ;;  %v72_v25 = vor.u32 %v71_v16, %v70_v13 }
  0xa8   :  { %v75_v27 = vor.u32 %v74_v17, %v73_v14  ;;  %v80_v28 = vshrl.u32 %v764_v43, %v65_v6  ;;  %v213_v24 = vsel %vm211_vm7, %v212_v20, %v831_v4  ;;  %vm82_vm8 = vcmp.lt.s32.totalorder %v63_v5, 1 }
  0xa9   :  { %v78_v29 = vor.u32 %v77_v21, %v76_v18  ;;  %vm85_vm9 = vcmp.lt.s32.totalorder %v63_v5, 4  ;;  %v214_v30 = vadd.s32 %v213_v24, %v209_v10  ;;  %vm84_vm10 = vcmp.lt.s32.totalorder %v63_v5, 3 }
  0xaa   :  { %v81_v31 = vor.u32 %v80_v28, %v79_v22  ;;  %v87_v32 = vsel %vm85_vm9, %v75_v27, 2102212464  ;;  %v66_v33 = vshrl.u32 %v759_v26, %v65_v6  ;;  %v90_v34 = vsel %vm82_vm8, %v69_v23, %v72_v25 }
  0xab   :  { %v91_v35 = vsel %vm85_vm9, %v78_v29, 920167782  ;;  %v94_v37 = vsel %vm82_vm8, %v72_v25, %v75_v27  ;;  %v215_v38 = vadd.s32 536870912, %v214_v30  ;;  %vm83_vm11 = vcmp.lt.s32.totalorder %v63_v5, 2 }
  0xac   :  { %v92_v36 = vsel %vm84_vm10, %v75_v27, %v91_v35  ;;  %v95_v39 = vsel %vm85_vm9, %v81_v31, 1326507024  ;;  %v86_v40 = vsel %vm82_vm8, %v66_v33, %v69_v23  ;;  %v88_v41 = vsel %vm84_vm10, %v72_v25, %v87_v32 }
  0xad   :  { %v93_v42 = vsel %vm83_vm11, %v90_v34, %v92_v36  ;;  %v96_v43 = vsel %vm84_vm10, %v78_v29, %v95_v39  ;;  %v841_v44 = vshrl.u32 %v215_v38, 30  ;;  %v89_v50 = vsel %vm83_vm11, %v86_v40, %v88_v41 }
  0xae   :  { %v97_v45 = vsel %vm83_vm11, %v94_v37, %v96_v43  ;;  %v843_v46 = vmul.u32.u64.low %v98_v9, %v93_v42  ;;  %v844_v47 = vmul.u32.u64.high %v98_v9, %v93_v42, %v843_v46  ;;  %v105_v53 = vmul.u32 %v98_v9, %v89_v50 }
  0xaf   :  { %v846_v48 = vmul.u32.u64.low %v98_v9, %v97_v45  ;;  %v847_v49 = vmul.u32.u64.high %v98_v9, %v97_v45, %v846_v48  ;;  %v217_v26 = vshll.u32 %v841_v44, 30  ;;  %v210_v1 = vadd.s32 %v830_v3, %v827_v2 }
  0xb0   :  { %v108_v52 = vadd.s32 1, %v844_v47  ;;  %v240_v35 = vsub.s32 4, %v841_v44  ;;  %vm52_vm2 = vcmp.lt.s32.totalorder %v807_v12, 0  ;;  %vm51_vm3 = vcmp.le.f32.partialorder %v50_v19, 0.7853982 }
  0xb1   :  { %v218_v51 = vsub.s32 %v214_v30, %v217_v26  ;;  %vm107_vm12 = vc.u32 %v847_v49, %v843_v46  ;;  %v106_v25 = vadd.s32 %v843_v46, %v847_v49  ;;  %vm246_vm7 = vweird.f32 %v803_v7 }
  0xb2   :  { %v109_v55 = vsel %vm107_vm12, %v108_v52, %v844_v47  ;;  %v241_v39 = vsel %vm156_vm15, %v240_v35, %v841_v44 }
  0xb3   :  { %v220_v54 = vsub.s32 0, %v218_v51  ;;  %v110_v56 = vadd.s32 %v109_v55, %v105_v53  ;;  %v243_v40 = vsel %vm155_vm1, 0, %v241_v39 }
  0xb4   :  { %v454_v45 = vand.u32 3, %v243_v40  ;;  %v247_v52 = vadd.s32 3, %v243_v40 }
  0xb5   :  { %v637_v57 = vmin.u32 %v220_v54, %v218_v51  ;;  %v111_v58 = vadd.s32 536870912, %v110_v56 }
  0xb6   :  { %vm459_vm4 = vcmp.eq.s32.totalorder %v454_v45, 2  ;;  %vm456_vm5 = vcmp.eq.s32.totalorder %v454_v45, 0  ;;  %vm455_vm6 = vcmp.lt.s32.totalorder %v454_v45, 2  ;;  %v248_v55 = vand.u32 3, %v247_v52 }
  0xb7   :  { %v222_v59 = vclz %v637_v57  ;;  %v112_v60 = vshrl.u32 %v111_v58, 30 }
  0xb8   :  { %vm249_vm8 = vcmp.lt.s32.totalorder %v248_v55, 2  ;;  %vm250_vm9 = vcmp.eq.s32.totalorder %v248_v55, 0  ;;  %vm253_vm10 = vcmp.eq.s32.totalorder %v248_v55, 2 }
  0xb9   :  { %v638_v61 = vadd.s32 4294967294, %v222_v59  ;;  %v113_v62 = vshll.u32 %v112_v60, 30  ;;  %v136_v42 = vsub.s32 4, %v112_v60 }
  0xbb   :  { %vm639_vm13 = vcmp.lt.s32.totalorder %v638_v61, 0  ;;  %v114_v0 = vsub.s32 %v110_v56, %v113_v62  ;;  %v137_v47 = vsel %vm52_vm2, %v136_v42, %v112_v60 }
  0xbc   :  { %v225_v63 = vsel %vm639_vm13, 0, %v638_v61  ;;  %v139_v50 = vsel %vm51_vm3, 0, %v137_v47 }
  0xbd   :  { %v226_v4 = vsub.s32 32, %v225_v63  ;;  %v230_v5 = vsub.s32 4294967266, %v225_v63  ;;  %v116_v6 = vsub.s32 0, %v114_v0  ;;  %v227_v9 = vshll.u32 %v218_v51, %v225_v63 }
  0xbe   :  { %v143_v54 = vadd.s32 3, %v139_v50  ;;  %v351_v56 = vand.u32 3, %v139_v50 }
  0xbf   :  { %v228_v10 = vshrl.u32 %v210_v1, %v226_v4  ;;  %v231_v11 = vadd.s32 127, %v230_v5  ;;  %v633_v13 = vmin.u32 %v116_v6, %v114_v0 }
  0xc0   :  { %v144_v57 = vand.u32 3, %v143_v54  ;;  %vm356_vm11 = vcmp.eq.s32.totalorder %v351_v56, 2  ;;  %vm353_vm12 = vcmp.eq.s32.totalorder %v351_v56, 0 }
  0xc1   :  { %v229_v14 = vor.u32 %v228_v10, %v227_v9  ;;  %v232_v15 = vshll.u32 %v231_v11, 23  ;;  %v118_v16 = vclz %v633_v13 }
  0xc2   :  { %vm146_vm13 = vcmp.eq.s32.totalorder %v144_v57, 0 }
  0xc3   :  { %v233_v17 = vor.u32 4788187, %v232_v15  ;;  %v634_v18 = vadd.s32 4294967294, %v118_v16  ;;  %v236_v21 = vcvt.s32.f32 %v229_v14  ;;  %v465_v15 = vld [vmem:[#allocation2 + $0x8] sm:$0xff] }
  0xc5   :  { %v234_v20 = vand.u32 2147483647, %v233_v17  ;;  %vm635_vm14 = vcmp.lt.s32.totalorder %v634_v18, 0 }
  0xc6   :  { %v121_v23 = vsel %vm635_vm14, 0, %v634_v18  ;;  %vm149_vm14 = vcmp.eq.s32.totalorder %v144_v57, 2 }
  0xc7   :  { %v237_v22 = vmul.f32 %v236_v21, %v234_v20  ;;  %v122_v2 = vsub.s32 32, %v121_v23  ;;  %v126_v3 = vsub.s32 4294967266, %v121_v23  ;;  %v123_v28 = vshll.u32 %v114_v0, %v121_v23 }
  0xc9   :  { %v238_v27 = vxor.u32 2147483648, %v237_v22  ;;  %v124_v24 = vshrl.u32 %v106_v25, %v122_v2  ;;  %v127_v29 = vadd.s32 127, %v126_v3 }
  0xcb   :  { %v239_v30 = vsel %vm156_vm15, %v238_v27, %v237_v22  ;;  %v125_v32 = vor.u32 %v124_v24, %v123_v28  ;;  %v128_v33 = vshll.u32 %v127_v29, 23  ;;  %vm352_vm15 = vcmp.lt.s32.totalorder %v351_v56, 2 }
  0xcc   :  { %v242_v31 = vsel %vm155_vm1, %v803_v7, %v239_v30  ;;  %vm142_vm1 = vweird.f32 %v807_v12 }
  0xcd   :  { %703 = vcosq.f32 %v242_v31  ;;  %v129_v34 = vor.u32 4788187, %v128_v33  ;;  %v132_v38 = vcvt.s32.f32 %v125_v32 }
  0xce   :  { %705 = vsinq.f32 %v242_v31 }
  0xcf   :  { %v130_v37 = vand.u32 2147483647, %v129_v34 }
  0xd1   :  { %v133_v36 = vmul.f32 %v132_v38, %v130_v37 }
  0xd3   :  { %v134_v8 = vxor.u32 2147483648, %v133_v36 }
  0xd5   :  { %v135_v41 = vsel %vm52_vm2, %v134_v8, %v133_v36  ;;  %vm145_vm2 = vcmp.lt.s32.totalorder %v144_v57, 2 }
  0xd6   :  { %v138_v43 = vsel %vm51_vm3, %v807_v12, %v135_v41  ;;  %v467_v12 = vld [vmem:[#allocation2 + $0x18] sm:$0xff] }
  0xd7   :  { %707 = vcosq.f32 %v138_v43 }
  0xd8   :  { %709 = vsinq.f32 %v138_v43 }
  0xda   :  { %v704_v46 = vpop.eup %703 }
  0xdb   :  { %v706_v48 = vpop.eup %705  ;;  %v254_v49 = vxor.u32 2147483648, %v704_v46 }
  0xdc   :  { %v251_v26 = vxor.u32 2147483648, %v706_v48 }
  0xdd   :  { %v461_v44 = vsel %vm459_vm4, %v254_v49, %v706_v48  ;;  %v255_v63 = vsel %vm253_vm10, %v254_v49, %v706_v48 }
  0xde   :  { %v458_v51 = vsel %vm456_vm5, %v704_v46, %v251_v26  ;;  %v252_v62 = vsel %vm250_vm9, %v704_v46, %v251_v26 }
  0xdf   :  { %v462_v19 = vsel %vm455_vm6, %v458_v51, %v461_v44  ;;  %v256_v9 = vsel %vm249_vm8, %v252_v62, %v255_v63 }
  0xe0   :  { %v463_v53 = vsel %vm246_vm7, nan, %v462_v19  ;;  %v257_v13 = vsel %vm246_vm7, nan, %v256_v9 }
  0xe1   :  { %660 = vmatprep.subr.mxu0 %v463_v53  ;;  %674 = vmatprep.subr.mxu1 %v463_v53 }
  0xe2   :  { %661 = vmatpush3.msra.mxu0 %v463_v53  ;;  %678 = vmatpush3.msra.mxu1 %v463_v53 }
  0xe4   :  { %v708_v58 = vpop.eup %707 }
  0xe5   :  { %v710_v59 = vpop.eup %709  ;;  %v150_v60 = vxor.u32 2147483648, %v708_v58 }
  0xe6   :  { %v147_v61 = vxor.u32 2147483648, %v710_v59 }
  0xe7   :  { %v358_v0 = vsel %vm356_vm11, %v150_v60, %v710_v59  ;;  %v151_v5 = vsel %vm149_vm14, %v150_v60, %v710_v59 }
  0xe8   :  { %v355_v1 = vsel %vm353_vm12, %v708_v58, %v147_v61  ;;  %v148_v4 = vsel %vm146_vm13, %v708_v58, %v147_v61 }
  0xe9   :  { %v359_v6 = vsel %vm352_vm15, %v355_v1, %v358_v0  ;;  %v152_v11 = vsel %vm145_vm2, %v148_v4, %v151_v5 }
  0xea   :  { %v360_v10 = vsel %vm142_vm1, nan, %v359_v6  ;;  %v153_v14 = vsel %vm142_vm1, nan, %v152_v11 }
  0xeb   :  { %662 = vmatprep.subr.mxu0 %v360_v10  ;;  %675 = vmatprep.subr.mxu1 %v360_v10 }
  0xec   :  { %663 = vmatpush3.msra.mxu0 %v360_v10  ;;  %679 = vmatpush3.msra.mxu1 %v360_v10 }
  0xed   :  { %664 = vmatprep.subr.mxu0 %v257_v13  ;;  %676 = vmatprep.subr.mxu1 %v257_v13 }
  0xee   :  { %665 = vmatpush3.msra.mxu0 %v257_v13  ;;  %680 = vmatpush3.msra.mxu1 %v257_v13 }
  0xef   :  { %666 = vmatprep.subr.mxu0 %v153_v14  ;;  %677 = vmatprep.subr.mxu1 %v153_v14 }
  0xf0   :  { %667 = vmatpush3.msra.mxu0 %v153_v14  ;;  %681 = vmatpush3.msra.mxu1 %v153_v14 }
  0xf1   :  { %669 = vmatmul.mubr.msk.f32.vlgmr.msra.gmra.mxu0 %vm468_vm0, %v465_v15  ;;  %672 = vmatmul.mubr.msk.f32.vlgmr.msra.gmra.mxu1 %vm468_vm0, %v467_v12 }
 0x1b1   :  { %v670_v16 = vpop.f32.mrf.mxu0  ;;  %v673_v7 = vpop.f32.mrf.mxu1 }
 0x1b3   :  { %v547_v17 = vpop.f32.mrf.mxu0  ;;  %v557_v18 = vpop.f32.mrf.mxu1 }
 0x1b4   :  { %566 = vxpose.xlu1.b32.start [1/4] (short) %v547_v17, 128 }
 0x1b8   :  { %567 = vxpose.xlu1.b32.cont [2/4] (short) %v670_v16, 128 }
 0x1bc   :  { %568 = vxpose.xlu1.b32.cont [3/4] (short) %v557_v18, 128 }
 0x1c0   :  { %569 = vxpose.xlu1.b32.end [4/4] (short) %v673_v7, 128 }
 0x230   :  { %v582_v20 = vpop.trf.xlu1 }
 0x231   :  { %598 = vst.msk [vmem:[#allocation5] sm:$0xff] %vm468_vm0, %v582_v20 }
 0x234   :  { %v583_v21 = vpop.trf.xlu1 }
 0x235   :  { %599 = vst.msk [vmem:[#allocation5 + $0x8] sm:$0xff] %vm468_vm0, %v583_v21 }
 0x238   :  { %v584_v22 = vpop.trf.xlu1 }
 0x239   :  { %600 = vst.msk [vmem:[#allocation5 + $0x10] sm:$0xff] %vm468_vm0, %v584_v22 }
 0x23c   :  { %v585_v23 = vpop.trf.xlu1 }
 0x23d   :  { %601 = vst.msk [vmem:[#allocation5 + $0x18] sm:$0xff] %vm468_vm0, %v585_v23 }
 0x240   :  { %v586_v25 = vpop.trf.xlu1 }
 0x241   :  { %602 = vst.msk [vmem:[#allocation5 + $0x20] sm:$0xff] %vm468_vm0, %v586_v25 }
 0x244   :  { %v587_v2 = vpop.trf.xlu1 }
 0x245   :  { %603 = vst.msk [vmem:[#allocation5 + $0x28] sm:$0xff] %vm468_vm0, %v587_v2 }
 0x248   :  { %v588_v3 = vpop.trf.xlu1 }
 0x249   :  { %604 = vst.msk [vmem:[#allocation5 + $0x30] sm:$0xff] %vm468_vm0, %v588_v3 }
 0x24c   :  { %v589_v27 = vpop.trf.xlu1 }
 0x24d   :  { %605 = vst.msk [vmem:[#allocation5 + $0x38] sm:$0xff] %vm468_vm0, %v589_v27 }
 0x250   :  { %v590_v28 = vpop.trf.xlu1 }
 0x251   :  { %606 = vst.msk [vmem:[#allocation5 + $0x40] sm:$0xff] %vm468_vm0, %v590_v28 }
 0x254   :  { %v591_v24 = vpop.trf.xlu1 }
 0x255   :  { %607 = vst.msk [vmem:[#allocation5 + $0x48] sm:$0xff] %vm468_vm0, %v591_v24 }
 0x258   :  { %v592_v29 = vpop.trf.xlu1 }
 0x259   :  { %608 = vst.msk [vmem:[#allocation5 + $0x50] sm:$0xff] %vm468_vm0, %v592_v29 }
 0x25c   :  { %v593_v30 = vpop.trf.xlu1 }
 0x25d   :  { %609 = vst.msk [vmem:[#allocation5 + $0x58] sm:$0xff] %vm468_vm0, %v593_v30 }
 0x260   :  { %v594_v31 = vpop.trf.xlu1 }
 0x261   :  { %610 = vst.msk [vmem:[#allocation5 + $0x60] sm:$0xff] %vm468_vm0, %v594_v31 }
 0x264   :  { %v595_v32 = vpop.trf.xlu1 }
 0x265   :  { %611 = vst.msk [vmem:[#allocation5 + $0x68] sm:$0xff] %vm468_vm0, %v595_v32 }
 0x268   :  { %v596_v33 = vpop.trf.xlu1 }
 0x269   :  { %612 = vst.msk [vmem:[#allocation5 + $0x70] sm:$0xff] %vm468_vm0, %v596_v33 }
 0x26c   :  { %v597_v34 = vpop.trf.xlu1 }
 0x26d   :  { %613 = vst.msk [vmem:[#allocation5 + $0x78] sm:$0xff] %vm468_vm0, %v597_v34 }
 0x26e   :  { %618 = vsyncadd [#allocation4], 1792  ;;  %s765_s0 = smov [#allocation5]  }
 0x26f   :  { %s619_s1 = sshll.u32 %s765_s0, 4  ;;  %s620_s1 = int_to_ptr.vmem [resolvable:$true] %s619_s1 }
 0x270   :  { %s731_s24 = scalar_lea.vmem %s620_s1, 256  ;;  %s735_s25 = scalar_lea.vmem %s620_s1, 2048 }
 0x271   :  { %p732_p5 = scmp.ne.s32.totalorder %s620_s1, %s731_s24  ;;  %p736_p6 = scmp.lt.s32.totalorder %s620_s1, %s620_s1 }
 0x272   :  { %p737_p7 = scmp.lt.s32.totalorder %s735_s25, %s731_s24 }
 0x274   :  { %p738_p8 = por %p737_p7, %p736_p6 }
 0x276   :  { %p739_p9 = pnand %p738_p8, %p732_p5 }
 0x278   :  { %742 = shalt.err (!%p739_p9)
}
 0x279   :  { %625 = dma.vmem_to_hbm [thread:$0]  %s620_s1, 256, %s904_s3, [#allocation4], %s756_s15, %s756_s15, %s757_s16  }
 0x27a   :  { %753 = dma.done.wait [#allocation4], 2048  }
 0x27b   :  { %754 = vsyncadd [#allocation4], 4294965248 }
 0x27c   :  { %629 = vsyncpa [#allocation3], 1 }
 0x27d   :  { %630 = vsyncpa [#allocation4], 1 }

</bundles_post_ra>
